<compile_context>
chip_gen: v7x
topology: tpu7x:2x2x1
jax: 0.10.0
libtpu: 0.0.40
codegen_flags: <defaults>
</compile_context>

<pallas_src>
import functools
import math

import jax
import jax.numpy as jnp
from jax import lax
from jax.experimental import pallas as pl
from jax.experimental.pallas import tpu as pltpu

_LANES = 128


def _bce_dice_partial_kernel(x_ref, t_ref, bce_out, inter_out, pt_out,
                             bce_acc, inter_acc, pt_acc,
                             *, rows, block_rows, needs_mask):
    """Grid = (split [parallel], chunk [arbitrary / reduction]).

    x_ref/t_ref: (N, block_rows, 128) tile of the (N, rows, 128) inputs.
    *_out:       (1, N, 128) per-split partial sums, written once per split.
    *_acc:       (N, 128) f32 VMEM scratch accumulators.
    """
    j = pl.program_id(1)
    n_chunks = pl.num_programs(1)

    @pl.when(j == 0)
    def _init():
        bce_acc[...] = jnp.zeros_like(bce_acc)
        inter_acc[...] = jnp.zeros_like(inter_acc)
        pt_acc[...] = jnp.zeros_like(pt_acc)

    x = x_ref[...].astype(jnp.float32)   # (N, R, 128)
    t = t_ref[...].astype(jnp.float32)   # (N, R, 128)

    # Single transcendental per element; both the stable BCE log-term and the
    # sigmoid are derived from e = exp(-|x|).
    e = jnp.exp(-jnp.abs(x))
    bce = jnp.maximum(x, 0.0) - x * t + jnp.log1p(e)
    inv = pl.reciprocal(1.0 + e, approx=True)      # EUP slot; ~2^-12 rel err
    p = jnp.where(x >= 0.0, inv, e * inv)          # == sigmoid(x)

    inter = p * t
    pt = p + t

    if needs_mask:
        # Ragged tail: the last chunk's block extends past `rows`; the extra
        # sublanes hold undefined data, so zero their contributions.  Traced
        # only when a ragged tail exists; non-tail chunks pay a few selects.
        chunk = pl.program_id(0) * n_chunks + j
        rid = chunk * block_rows + lax.broadcasted_iota(jnp.int32, x.shape, 1)
        m = rid < rows
        bce = jnp.where(m, bce, 0.0)
        inter = jnp.where(m, inter, 0.0)
        pt = jnp.where(m, pt, 0.0)

    # Reduce only the sublane (rows) axis per chunk; lanes stay resident.
    bce_acc[...] += jnp.sum(bce, axis=1)       # (N, 128)
    inter_acc[...] += jnp.sum(inter, axis=1)   # (N, 128)
    pt_acc[...] += jnp.sum(pt, axis=1)         # (N, 128)

    @pl.when(j == n_chunks - 1)
    def _finalize():
        bce_out[...] = bce_acc[...][None]
        inter_out[...] = inter_acc[...][None]
        pt_out[...] = pt_acc[...][None]


def _hw_params():
    """Generation-aware VMEM capacity / TensorCore count with safe fallbacks."""
    vmem_cap = 64 << 20      # conservative: v7x per-TC capacity
    tc_count = 1
    get_info = getattr(pltpu, "get_tpu_info", None)
    if get_info is not None:
        try:
            info = get_info()
            vmem_cap = int(getattr(info, "vmem_capacity_bytes", vmem_cap))
            for name in ("num_cores", "core_count", "tensorcores_per_chip",
                         "num_tensorcores"):
                v = getattr(info, name, None)
                if v:
                    tc_count = max(1, min(int(v), 2))   # no TPU has >2 TC/chip
                    break
        except Exception:
            pass
    return vmem_cap, tc_count


def bce_dice_loss(logits, target, *, smooth=1e-5, tile_bytes=None):
    """logits, target: (N, C, H, W) (any trailing shape). Returns scalar f32 loss."""
    assert logits.shape == target.shape
    n = int(logits.shape[0])
    d = int(math.prod(logits.shape[1:]))
    rows = -(-d // _LANES)
    d_lane = rows * _LANES

    vmem_cap, tc_count = _hw_params()
    if tile_bytes is None:
        tile_bytes = 2 << 20                      # ~2 MiB per input tile
    vmem_limit = int(min(max(vmem_cap // 2, 32 << 20), vmem_cap))

    x = logits.reshape(n, d)
    t = target.reshape(n, d)
    if d_lane != d:
        # Lane-pad only (< 128 elements per sample).  Pad values chosen so the
        # padded elements contribute exactly 0 to every partial sum:
        #   bce(x_min, 0) = 0, sigmoid(x_min) = 0.  (finfo.min is finite for
        #   every float dtype, so no inf/NaN even for f16.)
        if jnp.issubdtype(logits.dtype, jnp.floating):
            neg = jnp.finfo(logits.dtype).min
        else:
            neg = -(2 ** 24)
        x = jnp.pad(x, ((0, 0), (0, d_lane - d)), constant_values=neg)
        t = jnp.pad(t, ((0, 0), (0, d_lane - d)), constant_values=0)
    x3 = x.reshape(n, rows, _LANES)   # bitcast reshape, no copy
    t3 = t.reshape(n, rows, _LANES)

    # Tile sizing: cap each input tile at ~tile_bytes; round block_rows to the
    # stored dtype's sublane multiple (8 for f32, 16 for bf16, 32 for int8).
    itemsizes = (jnp.dtype(logits.dtype).itemsize, jnp.dtype(target.dtype).itemsize)
    sub_mult = max(32 // it for it in itemsizes)
    target_rows = max(int(tile_bytes) // (n * _LANES * max(itemsizes)), sub_mult)
    if target_rows >= rows:
        block_rows = rows          # full-extent block: always legal, single chunk
    else:
        block_rows = max((target_rows // sub_mult) * sub_mult, sub_mult)
    total_chunks = -(-rows // block_rows)

    # Split the streamed reduction across TensorCores only when it helps:
    # 1 on single-TC chips (v5e/v6e); up to 2 on v7x, and only with an even
    # split of >= 2 chunks each (no padded/wasted splits, no OOB blocks).
    n_splits = 1
    if tc_count > 1 and total_chunks % tc_count == 0 and total_chunks // tc_count >= 2:
        n_splits = tc_count
    chunks_per_split = total_chunks // n_splits
    needs_mask = total_chunks * block_rows > rows

    kernel = functools.partial(
        _bce_dice_partial_kernel,
        rows=rows, block_rows=block_rows, needs_mask=needs_mask)

    in_map = lambda s, j: (0, s * chunks_per_split + j, 0)
    out_map = lambda s, j: (s, 0, 0)
    part_shape = jax.ShapeDtypeStruct((n_splits, n, _LANES), jnp.float32)

    bce_part, inter_part, pt_part = pl.pallas_call(
        kernel,
        out_shape=(part_shape, part_shape, part_shape),
        grid=(n_splits, chunks_per_split),
        in_specs=[
            pl.BlockSpec((n, block_rows, _LANES), in_map),
            pl.BlockSpec((n, block_rows, _LANES), in_map),
        ],
        out_specs=(
            pl.BlockSpec((1, n, _LANES), out_map),
            pl.BlockSpec((1, n, _LANES), out_map),
            pl.BlockSpec((1, n, _LANES), out_map),
        ),
        scratch_shapes=[
            pltpu.VMEM((n, _LANES), jnp.float32),
            pltpu.VMEM((n, _LANES), jnp.float32),
            pltpu.VMEM((n, _LANES), jnp.float32),
        ],
        compiler_params=pltpu.CompilerParams(
            dimension_semantics=("parallel", "arbitrary"),
            vmem_limit_bytes=vmem_limit,
        ),
    )(x3, t3)

    # Tiny final cross-lane / scalar combine (a few hundred floats) in plain JAX.
    bce_mean = jnp.sum(bce_part) / (n * d)     # mean over ORIGINAL element count
    inter = jnp.sum(inter_part, axis=(0, 2))   # (N,)
    pt = jnp.sum(pt_part, axis=(0, 2))         # (N,)
    dice = (2.0 * inter + smooth) / (pt + smooth)
    dice_loss = 1.0 - jnp.sum(dice) / n
    return 0.5 * bce_mean + dice_loss


def _reference_loss(logits, target):
    """Pure-JAX reference mirroring the PyTorch forward exactly."""
    x = logits.astype(jnp.float32)
    t = target.astype(jnp.float32)
    bce = jnp.mean(jnp.maximum(x, 0.0) - x * t + jnp.log1p(jnp.exp(-jnp.abs(x))))
    smooth = 1e-5
    p = jax.nn.sigmoid(x)
    n = x.shape[0]
    pv = p.reshape(n, -1)
    tv = t.reshape(n, -1)
    inter = jnp.sum(pv * tv, axis=1)
    dice = (2.0 * inter + smooth) / (jnp.sum(pv, axis=1) + jnp.sum(tv, axis=1) + smooth)
    dice = 1.0 - jnp.sum(dice) / n
    return 0.5 * bce + dice


if __name__ == "__main__":
    # BCEDiceLoss has no parameters; deterministic logits + binary target mask.
    key = jax.random.PRNGKey(0)
    k_x, k_t = jax.random.split(key)

    # Tolerance is 2e-3 because sigmoid uses pl.reciprocal(approx=True)
    # (~2^-12 relative error), which is fine for a loss value.
    TOL = dict(rtol=2e-3, atol=2e-3)

    # Primary shape from the module spec: (N, C, H, W) = (2, 4, 16, 16).
    # D = 1024 is 128-divisible -> zero-copy path, single chunk.
    shape = (2, 4, 16, 16)
    logits = jax.random.normal(k_x, shape, dtype=jnp.float32)
    target = (jax.random.uniform(k_t, shape) > 0.5).astype(jnp.float32)
    loss = jax.block_until_ready(jax.jit(bce_dice_loss)(logits, target))
    ref = _reference_loss(logits, target)
    assert jnp.allclose(loss, ref, **TOL), (loss, ref)

    # Non-128-divisible D (lane-pad path) + forced multi-chunk streaming with a
    # ragged tail (exercises the in-kernel row mask).
    shape2 = (2, 3, 33, 17)
    logits2 = jax.random.normal(k_x, shape2, dtype=jnp.float32)
    target2 = (jax.random.uniform(k_t, shape2) > 0.5).astype(jnp.float32)
    loss2 = jax.block_until_ready(
        jax.jit(lambda a, b: bce_dice_loss(a, b, tile_bytes=8 * 1024))(logits2, target2))
    ref2 = _reference_loss(logits2, target2)
    assert jnp.allclose(loss2, ref2, **TOL), (loss2, ref2)

    # 128-divisible D, multi-chunk with a ragged tail and NO padding at all.
    shape3 = (2, 4, 48, 48)
    logits3 = jax.random.normal(k_x, shape3, dtype=jnp.float32)
    target3 = (jax.random.uniform(k_t, shape3) > 0.5).astype(jnp.float32)
    loss3 = jax.block_until_ready(
        jax.jit(lambda a, b: bce_dice_loss(a, b, tile_bytes=64 * 1024))(logits3, target3))
    ref3 = _reference_loss(logits3, target3)
    assert jnp.allclose(loss3, ref3, **TOL), (loss3, ref3)

    print("KERNEL_OK")
</pallas_src>

<mosaic_0001>
module attributes {stable_mosaic.version = 11 : i64} {
  func.func @_bce_dice_partial_kernel(%arg0: i32, %arg1: i32, %arg2: memref<2x8x128xf32, #tpu.memory_space<vmem>>, %arg3: memref<2x8x128xf32, #tpu.memory_space<vmem>>, %arg4: memref<1x2x128xf32, #tpu.memory_space<vmem>>, %arg5: memref<1x2x128xf32, #tpu.memory_space<vmem>>, %arg6: memref<1x2x128xf32, #tpu.memory_space<vmem>>, %arg7: memref<2x128xf32, #tpu.memory_space<vmem>>, %arg8: memref<2x128xf32, #tpu.memory_space<vmem>>, %arg9: memref<2x128xf32, #tpu.memory_space<vmem>>) attributes {dimension_semantics = [#tpu.dimension_semantics<parallel>, #tpu.dimension_semantics<arbitrary>], iteration_bounds = array<i64: 1, 1>, scalar_prefetch = 0 : i64, scratch_operands = 3 : i64, tpu.core_type = #tpu.core_type<tc>, window_params = [{transform_indices = @transform_0, window_bounds = array<i64: 2, 8, 128>}, {transform_indices = @transform_1, window_bounds = array<i64: 2, 8, 128>}, {transform_indices = @transform_2, window_bounds = array<i64: 1, 2, 128>}, {transform_indices = @transform_3, window_bounds = array<i64: 1, 2, 128>}, {transform_indices = @transform_4, window_bounds = array<i64: 1, 2, 128>}]} {
    %c0_i32 = arith.constant 0 : i32
    %0 = arith.cmpi eq, %arg1, %c0_i32 : i32
    %1 = arith.extui %0 : i1 to i32
    %c0_i32_0 = arith.constant 0 : i32
    %2 = arith.cmpi ne, %1, %c0_i32_0 : i32
    scf.if %2 {
      %cst_26 = arith.constant 0.000000e+00 : f32
      %39 = vector.broadcast %cst_26 : f32 to vector<2x128xf32>
      %c0_27 = arith.constant 0 : index
      %c0_28 = arith.constant 0 : index
      %40 = vector.load %arg7[%c0_27, %c0_28] : memref<2x128xf32, #tpu.memory_space<vmem>>, vector<2x128xf32>
      tpu.vector_store %arg7[%c0_27, %c0_28], %39 {strides = array<i32>} : memref<2x128xf32, #tpu.memory_space<vmem>>, vector<2x128xf32>,
      %cst_29 = arith.constant 0.000000e+00 : f32
      %41 = vector.broadcast %cst_29 : f32 to vector<2x128xf32>
      %c0_30 = arith.constant 0 : index
      %c0_31 = arith.constant 0 : index
      %42 = vector.load %arg8[%c0_30, %c0_31] : memref<2x128xf32, #tpu.memory_space<vmem>>, vector<2x128xf32>
      tpu.vector_store %arg8[%c0_30, %c0_31], %41 {strides = array<i32>} : memref<2x128xf32, #tpu.memory_space<vmem>>, vector<2x128xf32>,
      %cst_32 = arith.constant 0.000000e+00 : f32
      %43 = vector.broadcast %cst_32 : f32 to vector<2x128xf32>
      %c0_33 = arith.constant 0 : index
      %c0_34 = arith.constant 0 : index
      %44 = vector.load %arg9[%c0_33, %c0_34] : memref<2x128xf32, #tpu.memory_space<vmem>>, vector<2x128xf32>
      tpu.vector_store %arg9[%c0_33, %c0_34], %43 {strides = array<i32>} : memref<2x128xf32, #tpu.memory_space<vmem>>, vector<2x128xf32>,
    } else {
    }
    %c0 = arith.constant 0 : index
    %c0_1 = arith.constant 0 : index
    %c0_2 = arith.constant 0 : index
    %3 = vector.load %arg2[%c0, %c0_1, %c0_2] : memref<2x8x128xf32, #tpu.memory_space<vmem>>, vector<2x8x128xf32>
    %c0_3 = arith.constant 0 : index
    %c0_4 = arith.constant 0 : index
    %c0_5 = arith.constant 0 : index
    %4 = vector.load %arg3[%c0_3, %c0_4, %c0_5] : memref<2x8x128xf32, #tpu.memory_space<vmem>>, vector<2x8x128xf32>
    %5 = math.absf %3 : vector<2x8x128xf32>
    %cst = arith.constant 0.000000e+00 : f32
    %6 = vector.broadcast %cst : f32 to vector<2x8x128xf32>
    %7 = arith.subf %6, %5 : vector<2x8x128xf32>
    %8 = math.exp %7 : vector<2x8x128xf32>
    %cst_6 = arith.constant 0.000000e+00 : f32
    %9 = vector.broadcast %cst_6 : f32 to vector<2x8x128xf32>
    %10 = arith.maximumf %3, %9 : vector<2x8x128xf32>
    %11 = arith.mulf %3, %4 : vector<2x8x128xf32>
    %12 = arith.subf %10, %11 : vector<2x8x128xf32>
    %13 = math.log1p %8 : vector<2x8x128xf32>
    %14 = arith.addf %12, %13 : vector<2x8x128xf32>
    %cst_7 = arith.constant 1.000000e+00 : f32
    %15 = vector.broadcast %cst_7 : f32 to vector<2x8x128xf32>
    %16 = arith.addf %15, %8 : vector<2x8x128xf32>
    %17 = tpu.reciprocal %16 {approx = true} : vector<2x8x128xf32> -> vector<2x8x128xf32>
    %cst_8 = arith.constant 0.000000e+00 : f32
    %18 = vector.broadcast %cst_8 : f32 to vector<2x8x128xf32>
    %19 = arith.cmpf oge, %3, %18 : vector<2x8x128xf32>
    %20 = arith.mulf %8, %17 : vector<2x8x128xf32>
    %21 = arith.select %19, %17, %20 : vector<2x8x128xi1>, vector<2x8x128xf32>
    %22 = arith.mulf %21, %4 : vector<2x8x128xf32>
    %23 = arith.addf %21, %4 : vector<2x8x128xf32>
    %c0_9 = arith.constant 0 : index
    %c0_10 = arith.constant 0 : index
    %24 = vector.load %arg7[%c0_9, %c0_10] : memref<2x128xf32, #tpu.memory_space<vmem>>, vector<2x128xf32>
    %cst_11 = arith.constant dense<0.000000e+00> : vector<2x128xf32>
    %25 = vector.multi_reduction <add>, %14, %cst_11 [1] : vector<2x8x128xf32> to vector<2x128xf32>
    %26 = arith.addf %24, %25 : vector<2x128xf32>
    %c0_12 = arith.constant 0 : index
    %c0_13 = arith.constant 0 : index
    %27 = vector.load %arg7[%c0_12, %c0_13] : memref<2x128xf32, #tpu.memory_space<vmem>>, vector<2x128xf32>
    tpu.vector_store %arg7[%c0_12, %c0_13], %26 {strides = array<i32>} : memref<2x128xf32, #tpu.memory_space<vmem>>, vector<2x128xf32>,
    %c0_14 = arith.constant 0 : index
    %c0_15 = arith.constant 0 : index
    %28 = vector.load %arg8[%c0_14, %c0_15] : memref<2x128xf32, #tpu.memory_space<vmem>>, vector<2x128xf32>
    %cst_16 = arith.constant dense<0.000000e+00> : vector<2x128xf32>
    %29 = vector.multi_reduction <add>, %22, %cst_16 [1] : vector<2x8x128xf32> to vector<2x128xf32>
    %30 = arith.addf %28, %29 : vector<2x128xf32>
    %c0_17 = arith.constant 0 : index
    %c0_18 = arith.constant 0 : index
    %31 = vector.load %arg8[%c0_17, %c0_18] : memref<2x128xf32, #tpu.memory_space<vmem>>, vector<2x128xf32>
    tpu.vector_store %arg8[%c0_17, %c0_18], %30 {strides = array<i32>} : memref<2x128xf32, #tpu.memory_space<vmem>>, vector<2x128xf32>,
    %c0_19 = arith.constant 0 : index
    %c0_20 = arith.constant 0 : index
    %32 = vector.load %arg9[%c0_19, %c0_20] : memref<2x128xf32, #tpu.memory_space<vmem>>, vector<2x128xf32>
    %cst_21 = arith.constant dense<0.000000e+00> : vector<2x128xf32>
    %33 = vector.multi_reduction <add>, %23, %cst_21 [1] : vector<2x8x128xf32> to vector<2x128xf32>
    %34 = arith.addf %32, %33 : vector<2x128xf32>
    %c0_22 = arith.constant 0 : index
    %c0_23 = arith.constant 0 : index
    %35 = vector.load %arg9[%c0_22, %c0_23] : memref<2x128xf32, #tpu.memory_space<vmem>>, vector<2x128xf32>
    tpu.vector_store %arg9[%c0_22, %c0_23], %34 {strides = array<i32>} : memref<2x128xf32, #tpu.memory_space<vmem>>, vector<2x128xf32>,
    %c0_i32_24 = arith.constant 0 : i32
    %36 = arith.cmpi eq, %arg1, %c0_i32_24 : i32
    %37 = arith.extui %36 : i1 to i32
    %c0_i32_25 = arith.constant 0 : i32
    %38 = arith.cmpi ne, %37, %c0_i32_25 : i32
    scf.if %38 {
      %c0_26 = arith.constant 0 : index
      %c0_27 = arith.constant 0 : index
      %39 = vector.load %arg7[%c0_26, %c0_27] : memref<2x128xf32, #tpu.memory_space<vmem>>, vector<2x128xf32>
      %40 = vector.shape_cast %39 : vector<2x128xf32> to vector<1x2x128xf32>
      %c0_28 = arith.constant 0 : index
      %c0_29 = arith.constant 0 : index
      %c0_30 = arith.constant 0 : index
      %41 = vector.load %arg4[%c0_28, %c0_29, %c0_30] : memref<1x2x128xf32, #tpu.memory_space<vmem>>, vector<1x2x128xf32>
      tpu.vector_store %arg4[%c0_28, %c0_29, %c0_30], %40 {strides = array<i32>} : memref<1x2x128xf32, #tpu.memory_space<vmem>>, vector<1x2x128xf32>,
      %c0_31 = arith.constant 0 : index
      %c0_32 = arith.constant 0 : index
      %42 = vector.load %arg8[%c0_31, %c0_32] : memref<2x128xf32, #tpu.memory_space<vmem>>, vector<2x128xf32>
      %43 = vector.shape_cast %42 : vector<2x128xf32> to vector<1x2x128xf32>
      %c0_33 = arith.constant 0 : index
      %c0_34 = arith.constant 0 : index
      %c0_35 = arith.constant 0 : index
      %44 = vector.load %arg5[%c0_33, %c0_34, %c0_35] : memref<1x2x128xf32, #tpu.memory_space<vmem>>, vector<1x2x128xf32>
      tpu.vector_store %arg5[%c0_33, %c0_34, %c0_35], %43 {strides = array<i32>} : memref<1x2x128xf32, #tpu.memory_space<vmem>>, vector<1x2x128xf32>,
      %c0_36 = arith.constant 0 : index
      %c0_37 = arith.constant 0 : index
      %45 = vector.load %arg9[%c0_36, %c0_37] : memref<2x128xf32, #tpu.memory_space<vmem>>, vector<2x128xf32>
      %46 = vector.shape_cast %45 : vector<2x128xf32> to vector<1x2x128xf32>
      %c0_38 = arith.constant 0 : index
      %c0_39 = arith.constant 0 : index
      %c0_40 = arith.constant 0 : index
      %47 = vector.load %arg6[%c0_38, %c0_39, %c0_40] : memref<1x2x128xf32, #tpu.memory_space<vmem>>, vector<1x2x128xf32>
      tpu.vector_store %arg6[%c0_38, %c0_39, %c0_40], %46 {strides = array<i32>} : memref<1x2x128xf32, #tpu.memory_space<vmem>>, vector<1x2x128xf32>,
    } else {
    }
    return
  }
  func.func @transform_0(%arg0: i32, %arg1: i32) -> (i32, i32, i32) {
    %c1_i32 = arith.constant 1 : i32
    %0 = arith.muli %arg0, %c1_i32 : i32
    %1 = arith.addi %0, %arg1 : i32
    %c0_i32 = arith.constant 0 : i32
    %c0_i32_0 = arith.constant 0 : i32
    %c0_i32_1 = arith.constant 0 : i32
    return %c0_i32, %1, %c0_i32_0 : i32, i32, i32
  }
  func.func @transform_1(%arg0: i32, %arg1: i32) -> (i32, i32, i32) {
    %c1_i32 = arith.constant 1 : i32
    %0 = arith.muli %arg0, %c1_i32 : i32
    %1 = arith.addi %0, %arg1 : i32
    %c0_i32 = arith.constant 0 : i32
    %c0_i32_0 = arith.constant 0 : i32
    %c0_i32_1 = arith.constant 0 : i32
    return %c0_i32, %1, %c0_i32_0 : i32, i32, i32
  }
  func.func @transform_2(%arg0: i32, %arg1: i32) -> (i32, i32, i32) {
    %c0_i32 = arith.constant 0 : i32
    %c0_i32_0 = arith.constant 0 : i32
    %c0_i32_1 = arith.constant 0 : i32
    return %arg0, %c0_i32, %c0_i32_0 : i32, i32, i32
  }
  func.func @transform_3(%arg0: i32, %arg1: i32) -> (i32, i32, i32) {
    %c0_i32 = arith.constant 0 : i32
    %c0_i32_0 = arith.constant 0 : i32
    %c0_i32_1 = arith.constant 0 : i32
    return %arg0, %c0_i32, %c0_i32_0 : i32, i32, i32
  }
  func.func @transform_4(%arg0: i32, %arg1: i32) -> (i32, i32, i32) {
    %c0_i32 = arith.constant 0 : i32
    %c0_i32_0 = arith.constant 0 : i32
    %c0_i32_1 = arith.constant 0 : i32
    return %arg0, %c0_i32, %c0_i32_0 : i32, i32, i32
  }
}

</mosaic_0001>

<bundles_post_ra>
// kernel: bce_dice_loss.1
= control target key start
LH: loop header
LB: loop body
LE: loop exit
PB: predicated region body
PF: predicated region fallthrough
CT: control target
= control target key end

     0   :  { %v211_v0 = vmov 0.0   ;;  %vm122_vm4 = vcmask 1041409   ;;  %s261_s0 = inlined_call_operand.vmem [shape: f32[2,8,128], index: 0, kind: input, shape index: {}]   ;;  %s262_s1 = inlined_call_operand.vmem [shape: f32[2,8,128], index: 1, kind: input, shape index: {}]   ;;  %s263_s2 = inlined_call_operand.vmem [shape: f32[1,2,128], index: 2, kind: output, shape index: {0}]   ;;  %s264_s3 = inlined_call_operand.vmem [shape: f32[1,2,128], index: 3, kind: output, shape index: {1}]   ;;  %s265_s4 = inlined_call_operand.vmem [shape: f32[1,2,128], index: 4, kind: output, shape index: {2}]  }
   0x1   :  { %52 = vst [vmem:[#allocation2] sm:$0x3] %v211_v0  ;;  %53 = vst [vmem:[#allocation3] sm:$0x3] %v211_v0  ;;  %v55_v1 = vld [vmem:[%s261_s0] sm:$0xff]  ;;  %v56_v2 = vld [vmem:[%s261_s0 + $0x8] sm:$0xff] }
   0x2   :  { %54 = vst [vmem:[#allocation4] sm:$0x3] %v211_v0  ;;  %v59_v3 = vand.u32 2147483647, %v55_v1  ;;  %v60_v4 = vand.u32 2147483647, %v56_v2 }
   0x3   :  { %v57_v15 = vld [vmem:[%s262_s1] sm:$0xff]  ;;  %v58_v16 = vld [vmem:[%s262_s1 + $0x8] sm:$0xff]  ;;  %v67_v18 = vmax.f32 %v55_v1, 0.0  ;;  %v68_v22 = vmax.f32 %v56_v2, 0.0  ;;  %vm97_vm2 = vcmp.ge.f32.partialorder %v55_v1, 0.0  ;;  %vm98_vm3 = vcmp.ge.f32.partialorder %v56_v2, 0.0 }
   0x4   :  { %v61_v5 = vsub.f32 0.0, %v59_v3  ;;  %v62_v6 = vsub.f32 0.0, %v60_v4  ;;  %v69_v19 = vmul.f32 %v57_v15, %v55_v1  ;;  %v70_v23 = vmul.f32 %v58_v16, %v56_v2 }
   0x6   :  { %v63_v7 = vmul.f32 1.442695, %v61_v5  ;;  %v65_v8 = vmul.f32 1.442695, %v62_v6  ;;  %v71_v27 = vsub.f32 %v67_v18, %v69_v19  ;;  %v72_v30 = vsub.f32 %v68_v22, %v70_v23 }
   0x8   :  { %199 = vpow2.f32 %v63_v7  ;;  %v127_v19 = vld [vmem:[#allocation3] sm:$0x3] }
   0x9   :  { %201 = vpow2.f32 %v65_v8 }
  0x12   :  { %v200_v9 = vpop.eup %199 }
  0x13   :  { %v202_v10 = vpop.eup %201  ;;  %v73_v11 = vadd.f32 1.0, %v200_v9  ;;  %v76_v13 = vmul.f32 -0.5, %v200_v9  ;;  %v79_v20 = vand.u32 2147483647, %v200_v9 }
  0x14   :  { %v82_v12 = vadd.f32 1.0, %v202_v10  ;;  %v85_v14 = vmul.f32 -0.5, %v202_v10  ;;  %v88_v24 = vand.u32 2147483647, %v202_v10 }
  0x15   :  { %203 = vlog2.f32 %v73_v11  ;;  %v77_v17 = vadd.f32 1.0, %v76_v13  ;;  %vm80_vm0 = vcmp.lt.f32.partialorder %v79_v20, 0.0004427343 }
  0x16   :  { %205 = vlog2.f32 %v82_v12  ;;  %v86_v21 = vadd.f32 1.0, %v85_v14  ;;  %vm89_vm1 = vcmp.lt.f32.partialorder %v88_v24, 0.0004427343 }
  0x17   :  { %207 = vrcp.f32 %v73_v11  ;;  %v78_v25 = vmul.f32 %v200_v9, %v77_v17 }
  0x18   :  { %209 = vrcp.f32 %v82_v12  ;;  %v87_v28 = vmul.f32 %v202_v10, %v86_v21  ;;  %v107_v12 = vld [vmem:[#allocation2] sm:$0x3]  ;;  %v146_v21 = vld [vmem:[#allocation4] sm:$0x3] }
  0x1f   :  { %v204_v26 = vpop.eup %203 }
  0x20   :  { %v206_v29 = vpop.eup %205  ;;  %v75_v31 = vmul.f32 0.6931472, %v204_v26 }
  0x21   :  { %v208_v32 = vpop.eup %207  ;;  %v84_v33 = vmul.f32 0.6931472, %v206_v29 }
  0x22   :  { %v210_v34 = vpop.eup %209  ;;  %v81_v35 = vsel %vm80_vm0, %v78_v25, %v75_v31  ;;  %v99_v36 = vmul.f32 %v208_v32, %v200_v9 }
  0x23   :  { %v90_v37 = vsel %vm89_vm1, %v87_v28, %v84_v33  ;;  %v91_v38 = vadd.f32 %v81_v35, %v71_v27  ;;  %v100_v39 = vmul.f32 %v210_v34, %v202_v10 }
  0x24   :  { %v92_v40 = vadd.f32 %v90_v37, %v72_v30  ;;  %v101_v41 = vsel %vm97_vm2, %v208_v32, %v99_v36 }
  0x25   :  { %v108_v42 = vrot.slane %v91_v38, 4  ;;  %v102_v43 = vsel %vm98_vm3, %v210_v34, %v100_v39  ;;  %v103_v44 = vmul.f32 %v101_v41, %v57_v15  ;;  %v105_v45 = vadd.f32 %v101_v41, %v57_v15 }
  0x26   :  { %v114_v46 = vrot.slane %v92_v40, 4  ;;  %v104_v47 = vmul.f32 %v102_v43, %v58_v16  ;;  %v106_v48 = vadd.f32 %v102_v43, %v58_v16 }
  0x27   :  { %v109_v49 = vadd.f32 %v108_v42, %v91_v38  ;;  %v128_v50 = vrot.slane %v103_v44, 4  ;;  %v147_v51 = vrot.slane %v105_v45, 4 }
  0x28   :  { %v115_v52 = vadd.f32 %v114_v46, %v92_v40  ;;  %v134_v53 = vrot.slane %v104_v47, 4  ;;  %v153_v54 = vrot.slane %v106_v48, 4 }
  0x29   :  { %v110_v55 = vrot.slane %v109_v49, 2  ;;  %v129_v56 = vadd.f32 %v128_v50, %v103_v44  ;;  %v148_v57 = vadd.f32 %v147_v51, %v105_v45 }
  0x2a   :  { %v116_v58 = vrot.slane %v115_v52, 2  ;;  %v135_v59 = vadd.f32 %v134_v53, %v104_v47  ;;  %v154_v60 = vadd.f32 %v153_v54, %v106_v48 }
  0x2b   :  { %v111_v61 = vadd.f32 %v110_v55, %v109_v49  ;;  %v130_v62 = vrot.slane %v129_v56, 2  ;;  %v149_v63 = vrot.slane %v148_v57, 2 }
  0x2c   :  { %v117_v0 = vadd.f32 %v116_v58, %v115_v52  ;;  %v136_v1 = vrot.slane %v135_v59, 2  ;;  %v155_v2 = vrot.slane %v154_v60, 2 }
  0x2d   :  { %v112_v3 = vrot.slane %v111_v61, 1  ;;  %v131_v4 = vadd.f32 %v130_v62, %v129_v56  ;;  %v150_v5 = vadd.f32 %v149_v63, %v148_v57 }
  0x2e   :  { %v118_v6 = vrot.slane %v117_v0, 1  ;;  %v137_v7 = vadd.f32 %v136_v1, %v135_v59  ;;  %v156_v8 = vadd.f32 %v155_v2, %v154_v60 }
  0x2f   :  { %v113_v9 = vadd.f32 %v112_v3, %v111_v61  ;;  %v132_v10 = vrot.slane %v131_v4, 1  ;;  %v151_v11 = vrot.slane %v150_v5, 1 }
  0x30   :  { %v119_v13 = vadd.f32 %v118_v6, %v117_v0  ;;  %v138_v14 = vrot.slane %v137_v7, 1  ;;  %v157_v15 = vrot.slane %v156_v8, 1 }
  0x31   :  { %v133_v16 = vadd.f32 %v132_v10, %v131_v4  ;;  %v152_v17 = vadd.f32 %v151_v11, %v150_v5 }
  0x32   :  { %v123_v18 = vsel %vm122_vm4, %v119_v13, %v113_v9  ;;  %v139_v20 = vadd.f32 %v138_v14, %v137_v7  ;;  %v158_v22 = vadd.f32 %v157_v15, %v156_v8 }
  0x33   :  { %v125_v23 = vadd.f32 %v123_v18, %v107_v12 }
  0x34   :  { %v142_v24 = vsel %vm122_vm4, %v139_v20, %v133_v16  ;;  %v161_v25 = vsel %vm122_vm4, %v158_v22, %v152_v17 }
  0x35   :  { %126 = vst [vmem:[#allocation2] sm:$0x3] %v125_v23  ;;  %v144_v26 = vadd.f32 %v142_v24, %v127_v19  ;;  %v163_v27 = vadd.f32 %v161_v25, %v146_v21 }
  0x37   :  { %145 = vst [vmem:[#allocation3] sm:$0x3] %v144_v26  ;;  %164 = vst [vmem:[#allocation4] sm:$0x3] %v163_v27 }
  0x3c   :  { %v168_v28 = vld [vmem:[#allocation2] sm:$0x3] }
  0x3d   :  { %169 = vst [vmem:[%s263_s2] sm:$0x3] %v168_v28 }
  0x3e   :  { %v170_v29 = vld [vmem:[#allocation3] sm:$0x3]  ;;  %v172_v30 = vld [vmem:[#allocation4] sm:$0x3] }
  0x3f   :  { %171 = vst [vmem:[%s264_s3] sm:$0x3] %v170_v29  ;;  %173 = vst [vmem:[%s265_s4] sm:$0x3] %v172_v30 }

</bundles_post_ra>
